<compile_context>
chip_gen: v7x
topology: tpu7x:2x2x1
jax: 0.10.0
libtpu: 0.0.40
codegen_flags: <defaults>
</compile_context>

<pallas_src>
import jax
import jax.numpy as jnp
import numpy as np
from jax.experimental import pallas as pl
from jax.experimental.pallas import tpu as pltpu


OUT_PAD = 128  # lane-dense padded width for the 2-class logits


# -----------------------------------------------------------------------------
# Fused Pallas kernel (whole forward pass for ONE batch element per grid step)
# -----------------------------------------------------------------------------
def make_fused_coma_kernel(n_layers, Ks, M_last, F_last):
    """Kernel ref layout (all VMEM):
        refs = [ x(1,N0,F0),
                 per layer i: L(Ni,Ni), W_0..W_{K-1}(Fi,F{i+1}), bias(1,F{i+1}),
                              D(N{i+1},Ni),
                 w_enc(M*F,z), b_enc(1,z), w_cls(z,128), b_cls(1,128),
                 out(1,1,128) ]
    """

    def kernel(*refs):
        x = refs[0][0]                                    # (N0, F0), bf16
        idx = 1
        for i in range(n_layers):
            K = Ks[i]
            L = refs[idx][...]                            # (Ni, Ni)  bf16
            Ws = [refs[idx + 1 + k][...] for k in range(K)]   # (Fi, F{i+1}) bf16
            bias = refs[idx + 1 + K][...]                 # (1, F{i+1}) f32
            D = refs[idx + 2 + K][...]                    # (N{i+1}, Ni) bf16
            idx += 3 + K

            # Chebyshev recursion, accumulated per-k (no lane-offset concat).
            t_prev = x                                                     # T0
            acc = jnp.dot(t_prev, Ws[0], preferred_element_type=jnp.float32)
            if K > 1:
                t_cur = jnp.dot(L, t_prev,                                 # T1
                                preferred_element_type=jnp.float32
                                ).astype(jnp.bfloat16)
                acc = acc + jnp.dot(t_cur, Ws[1],
                                    preferred_element_type=jnp.float32)
                for k in range(2, K):
                    t_nxt = (2.0 * jnp.dot(L, t_cur,
                                           preferred_element_type=jnp.float32)
                             - t_prev.astype(jnp.float32)).astype(jnp.bfloat16)
                    acc = acc + jnp.dot(t_nxt, Ws[k],
                                        preferred_element_type=jnp.float32)
                    t_prev, t_cur = t_cur, t_nxt

            acc = jnp.maximum(acc + bias, 0.0)             # bias + ReLU (f32)
            # Pool: (N{i+1}, Ni) @ (Ni, F{i+1})
            x = jnp.dot(D, acc.astype(jnp.bfloat16),
                        preferred_element_type=jnp.float32).astype(jnp.bfloat16)

        w_enc = refs[idx][...]        # (M_last*F_last, z) bf16, rows m-major over f
        b_enc = refs[idx + 1][...]    # (1, z)  f32
        w_cls = refs[idx + 2][...]    # (z, OUT_PAD) bf16 (zero padded)
        b_cls = refs[idx + 3][...]    # (1, OUT_PAD) f32 (zero padded)
        o_ref = refs[idx + 4]         # (1, 1, OUT_PAD)

        # enc_lin without an explicit flatten: M_last aligned, accumulated
        # row-block matmuls (w_enc rows are m-major over f, matching reshape).
        h = b_enc
        for m in range(M_last):
            h = h + jnp.dot(x[m:m + 1, :],
                            w_enc[m * F_last:(m + 1) * F_last, :],
                            preferred_element_type=jnp.float32)
        h = jnp.maximum(h, 0.0)                            # ReLU(enc_lin)

        o_ref[0] = jnp.dot(h.astype(jnp.bfloat16), w_cls,
                           preferred_element_type=jnp.float32) + b_cls

    return kernel


# -----------------------------------------------------------------------------
# One-time builder: packs parameters (bf16 cast, padding) and returns a jitted
# forward that only reshapes/casts x and calls the single pallas_call.
# -----------------------------------------------------------------------------
def build_coma_forward(params, config):
    B = config["batch_size"]
    n_layers = config["n_layers"]
    filters = config["filters"]
    num_nodes = config["num_nodes"]
    Ks = tuple(config["K"])
    z = config["z"]

    N0, F0 = num_nodes[0], filters[0]
    M_last, F_last = num_nodes[n_layers], filters[n_layers]
    n_cls = params["w_cls"].shape[1]

    def const_spec(shape):
        nd = len(shape)
        return pl.BlockSpec(shape, lambda b, _nd=nd: (0,) * _nd)

    operands = []
    in_specs = [pl.BlockSpec((1, N0, F0), lambda b: (b, 0, 0))]   # x, per-batch

    for i in range(n_layers):
        L = params["L"][i].astype(jnp.bfloat16)                   # (Ni, Ni)
        Wk = [params["cheb_w"][i][k].astype(jnp.bfloat16)
              for k in range(Ks[i])]                              # (Fi, F{i+1})
        bias = params["cheb_b"][i].reshape(1, -1).astype(jnp.float32)
        D = params["D"][i].astype(jnp.bfloat16)                   # (N{i+1}, Ni)
        layer_ops = [L] + Wk + [bias, D]
        operands += layer_ops
        in_specs += [const_spec(op.shape) for op in layer_ops]

    w_enc = params["w_enc"].astype(jnp.bfloat16)                  # (M*F, z)
    b_enc = params["b_enc"].reshape(1, -1).astype(jnp.float32)    # (1, z)
    w_cls_pad = (jnp.zeros((z, OUT_PAD), jnp.float32)
                 .at[:, :n_cls].set(params["w_cls"])).astype(jnp.bfloat16)
    b_cls_pad = (jnp.zeros((1, OUT_PAD), jnp.float32)
                 .at[:, :n_cls].set(params["b_cls"]))
    tail_ops = [w_enc, b_enc, w_cls_pad, b_cls_pad]
    operands += tail_ops
    in_specs += [const_spec(op.shape) for op in tail_ops]

    kernel = make_fused_coma_kernel(n_layers, Ks, M_last, F_last)

    call = pl.pallas_call(
        kernel,
        out_shape=jax.ShapeDtypeStruct((B, 1, OUT_PAD), jnp.float32),
        grid=(B,),
        in_specs=in_specs,
        out_specs=pl.BlockSpec((1, 1, OUT_PAD), lambda b: (b, 0, 0)),
        compiler_params=pltpu.CompilerParams(
            dimension_semantics=("parallel",),      # 2 TCs on v7x, neutral elsewhere
            vmem_limit_bytes=32 * 1024 * 1024),
    )

    packed = tuple(operands)   # packed once, closed over as jit constants

    @jax.jit
    def forward(x_flat):
        x = x_flat.reshape(B, N0, F0).astype(jnp.bfloat16)
        out_pad = call(x, *packed)                 # (B, 1, OUT_PAD)
        return out_pad[:, 0, :n_cls]               # (B, 2)

    return forward


# -----------------------------------------------------------------------------
# Graph / parameter construction (glue, plain numpy / JAX)
# -----------------------------------------------------------------------------
def ring_norm_matrix(n):
    """Dense equivalent of ChebConv_Coma.norm for a ring graph:
    L = -D^{-1/2} A D^{-1/2}, no self loops."""
    A = np.zeros((n, n), np.float32)
    for i in range(n):
        A[i, (i + 1) % n] = 1.0
        A[i, (i - 1) % n] = 1.0
    deg = A.sum(axis=1)
    dinv = np.where(deg > 0, 1.0 / np.sqrt(deg), 0.0)
    L = -(dinv[:, None] * A * dinv[None, :])
    return jnp.asarray(L, jnp.float32)


def avg_downsample(m, n):
    """Dense pooling matrix: new node m averages old nodes 2m, 2m+1."""
    P = np.zeros((m, n), np.float32)
    for i in range(m):
        P[i, (2 * i) % n] = 0.5
        P[i, (2 * i + 1) % n] = 0.5
    return jnp.asarray(P)


# -----------------------------------------------------------------------------
# Pure-JAX f32 reference for a correctness check
# -----------------------------------------------------------------------------
def coma_reference(x_flat, params, config):
    B = config["batch_size"]
    filters = config["filters"]
    x = x_flat.reshape(B, -1, filters[0])
    for i in range(config["n_layers"]):
        L, W, b, D = params["L"][i], params["cheb_w"][i], params["cheb_b"][i], params["D"][i]
        K = W.shape[0]
        T0 = x
        out = jnp.einsum("bnf,fo->bno", T0, W[0])
        if K > 1:
            T1 = jnp.einsum("mn,bnf->bmf", L, T0)
            out = out + jnp.einsum("bnf,fo->bno", T1, W[1])
            for k in range(2, K):
                T2 = 2.0 * jnp.einsum("mn,bnf->bmf", L, T1) - T0
                out = out + jnp.einsum("bnf,fo->bno", T2, W[k])
                T0, T1 = T1, T2
        out = jax.nn.relu(out + b)
        x = jnp.einsum("mn,bnf->bmf", D, out)
    x = x.reshape(B, -1)
    h = jax.nn.relu(x @ params["w_enc"] + params["b_enc"])
    return h @ params["w_cls"] + params["b_cls"]


# -----------------------------------------------------------------------------
if __name__ == "__main__":
    # small but representative configuration
    config = {
        "batch_size": 2,
        "n_layers": 2,
        "filters": [3, 8, 16],        # num_features inserted at position 0
        "K": [3, 3],                  # polygon_order
        "z": 16,
        "num_nodes": [32, 16, 8],
    }
    B = config["batch_size"]
    filters = config["filters"]
    num_nodes = config["num_nodes"]
    z = config["z"]

    key = jax.random.PRNGKey(0)
    keys = jax.random.split(key, 16)
    ki = iter(keys)

    params = {"L": [], "D": [], "cheb_w": [], "cheb_b": []}
    for i in range(config["n_layers"]):
        params["L"].append(ring_norm_matrix(num_nodes[i]))
        params["D"].append(avg_downsample(num_nodes[i + 1], num_nodes[i]))
        # ChebConv_Coma.reset_parameters: normal(0, 0.1) for weight and bias
        params["cheb_w"].append(
            0.1 * jax.random.normal(next(ki),
                                    (config["K"][i], filters[i], filters[i + 1]),
                                    jnp.float32))
        params["cheb_b"].append(
            0.1 * jax.random.normal(next(ki), (filters[i + 1],), jnp.float32))

    enc_in = num_nodes[-1] * filters[-1]       # downsample[-1].shape[0] * filters[-1]
    # stored pre-transposed (in, out) so kernels do x @ W
    params["w_enc"] = 0.1 * jax.random.normal(next(ki), (enc_in, z), jnp.float32)
    params["b_enc"] = 0.1 * jax.random.normal(next(ki), (z,), jnp.float32)
    params["w_cls"] = 0.1 * jax.random.normal(next(ki), (z, 2), jnp.float32)
    params["b_cls"] = 0.1 * jax.random.normal(next(ki), (2,), jnp.float32)

    # data.x : (B * N0, num_features), reshaped to (B, N0, F0) inside forward
    x_flat = jax.random.normal(next(ki), (B * num_nodes[0], filters[0]), jnp.float32)

    forward = build_coma_forward(params, config)   # one-time packing / compile
    out = jax.block_until_ready(forward(x_flat))

    ref = jax.block_until_ready(coma_reference(x_flat, params, config))
    assert out.shape == (B, 2)
    # bf16 operands with f32 accumulation -> relaxed tolerance vs. f32 reference
    np.testing.assert_allclose(np.asarray(out), np.asarray(ref), rtol=5e-2, atol=3e-3)

    print("KERNEL_OK")
</pallas_src>

<mosaic_0001>
module attributes {stable_mosaic.version = 11 : i64} {
  func.func @kernel(%arg0: i32, %arg1: memref<1x32x3xbf16, #tpu.memory_space<vmem>>, %arg2: memref<32x32xbf16, #tpu.memory_space<vmem>>, %arg3: memref<3x8xbf16, #tpu.memory_space<vmem>>, %arg4: memref<3x8xbf16, #tpu.memory_space<vmem>>, %arg5: memref<3x8xbf16, #tpu.memory_space<vmem>>, %arg6: memref<1x8xf32, #tpu.memory_space<vmem>>, %arg7: memref<16x32xbf16, #tpu.memory_space<vmem>>, %arg8: memref<16x16xbf16, #tpu.memory_space<vmem>>, %arg9: memref<8x16xbf16, #tpu.memory_space<vmem>>, %arg10: memref<8x16xbf16, #tpu.memory_space<vmem>>, %arg11: memref<8x16xbf16, #tpu.memory_space<vmem>>, %arg12: memref<1x16xf32, #tpu.memory_space<vmem>>, %arg13: memref<8x16xbf16, #tpu.memory_space<vmem>>, %arg14: memref<128x16xbf16, #tpu.memory_space<vmem>>, %arg15: memref<1x16xf32, #tpu.memory_space<vmem>>, %arg16: memref<16x128xbf16, #tpu.memory_space<vmem>>, %arg17: memref<1x128xf32, #tpu.memory_space<vmem>>, %arg18: memref<1x1x128xf32, #tpu.memory_space<vmem>>) attributes {dimension_semantics = [#tpu.dimension_semantics<parallel>], iteration_bounds = array<i64: 2>, scalar_prefetch = 0 : i64, scratch_operands = 0 : i64, tpu.core_type = #tpu.core_type<tc>, window_params = [{transform_indices = @transform_0, window_bounds = array<i64: 1, 32, 3>}, {pipeline_mode = #tpu.pipeline_mode<synchronous>, transform_indices = @transform_1, window_bounds = array<i64: 32, 32>}, {pipeline_mode = #tpu.pipeline_mode<synchronous>, transform_indices = @transform_2, window_bounds = array<i64: 3, 8>}, {pipeline_mode = #tpu.pipeline_mode<synchronous>, transform_indices = @transform_3, window_bounds = array<i64: 3, 8>}, {pipeline_mode = #tpu.pipeline_mode<synchronous>, transform_indices = @transform_4, window_bounds = array<i64: 3, 8>}, {pipeline_mode = #tpu.pipeline_mode<synchronous>, transform_indices = @transform_5, window_bounds = array<i64: 1, 8>}, {pipeline_mode = #tpu.pipeline_mode<synchronous>, transform_indices = @transform_6, window_bounds = array<i64: 16, 32>}, {pipeline_mode = #tpu.pipeline_mode<synchronous>, transform_indices = @transform_7, window_bounds = array<i64: 16, 16>}, {pipeline_mode = #tpu.pipeline_mode<synchronous>, transform_indices = @transform_8, window_bounds = array<i64: 8, 16>}, {pipeline_mode = #tpu.pipeline_mode<synchronous>, transform_indices = @transform_9, window_bounds = array<i64: 8, 16>}, {pipeline_mode = #tpu.pipeline_mode<synchronous>, transform_indices = @transform_10, window_bounds = array<i64: 8, 16>}, {pipeline_mode = #tpu.pipeline_mode<synchronous>, transform_indices = @transform_11, window_bounds = array<i64: 1, 16>}, {pipeline_mode = #tpu.pipeline_mode<synchronous>, transform_indices = @transform_12, window_bounds = array<i64: 8, 16>}, {pipeline_mode = #tpu.pipeline_mode<synchronous>, transform_indices = @transform_13, window_bounds = array<i64: 128, 16>}, {pipeline_mode = #tpu.pipeline_mode<synchronous>, transform_indices = @transform_14, window_bounds = array<i64: 1, 16>}, {pipeline_mode = #tpu.pipeline_mode<synchronous>, transform_indices = @transform_15, window_bounds = array<i64: 16, 128>}, {pipeline_mode = #tpu.pipeline_mode<synchronous>, transform_indices = @transform_16, window_bounds = array<i64: 1, 128>}, {transform_indices = @transform_17, window_bounds = array<i64: 1, 1, 128>}]} {
    %c0 = arith.constant 0 : index
    %c0_0 = arith.constant 0 : index
    %c0_1 = arith.constant 0 : index
    %0 = vector.load %arg1[%c0, %c0_0, %c0_1] : memref<1x32x3xbf16, #tpu.memory_space<vmem>>, vector<1x32x3xbf16>
    %1 = vector.shape_cast %0 : vector<1x32x3xbf16> to vector<32x3xbf16>
    %c0_2 = arith.constant 0 : index
    %c0_3 = arith.constant 0 : index
    %2 = vector.load %arg2[%c0_2, %c0_3] : memref<32x32xbf16, #tpu.memory_space<vmem>>, vector<32x32xbf16>
    %c0_4 = arith.constant 0 : index
    %c0_5 = arith.constant 0 : index
    %3 = vector.load %arg3[%c0_4, %c0_5] : memref<3x8xbf16, #tpu.memory_space<vmem>>, vector<3x8xbf16>
    %c0_6 = arith.constant 0 : index
    %c0_7 = arith.constant 0 : index
    %4 = vector.load %arg4[%c0_6, %c0_7] : memref<3x8xbf16, #tpu.memory_space<vmem>>, vector<3x8xbf16>
    %c0_8 = arith.constant 0 : index
    %c0_9 = arith.constant 0 : index
    %5 = vector.load %arg5[%c0_8, %c0_9] : memref<3x8xbf16, #tpu.memory_space<vmem>>, vector<3x8xbf16>
    %c0_10 = arith.constant 0 : index
    %c0_11 = arith.constant 0 : index
    %6 = vector.load %arg6[%c0_10, %c0_11] : memref<1x8xf32, #tpu.memory_space<vmem>>, vector<1x8xf32>
    %c0_12 = arith.constant 0 : index
    %c0_13 = arith.constant 0 : index
    %7 = vector.load %arg7[%c0_12, %c0_13] : memref<16x32xbf16, #tpu.memory_space<vmem>>, vector<16x32xbf16>
    %cst = arith.constant dense<0.000000e+00> : vector<32x8xf32>
    %8 = tpu.matmul %1, %3, %cst {dimension_numbers = #tpu.dot_dimension_numbers<[1], [0], [0], [1], [0, 0, 1, 1], [], []>} : vector<32x3xbf16>, vector<3x8xbf16>, vector<32x8xf32> -> vector<32x8xf32>
    %cst_14 = arith.constant dense<0.000000e+00> : vector<32x3xf32>
    %9 = tpu.matmul %2, %1, %cst_14 {dimension_numbers = #tpu.dot_dimension_numbers<[1], [0], [0], [1], [0, 0, 1, 1], [], []>} : vector<32x32xbf16>, vector<32x3xbf16>, vector<32x3xf32> -> vector<32x3xf32>
    %10 = arith.truncf %9 : vector<32x3xf32> to vector<32x3xbf16>
    %cst_15 = arith.constant dense<0.000000e+00> : vector<32x8xf32>
    %11 = tpu.matmul %10, %4, %cst_15 {dimension_numbers = #tpu.dot_dimension_numbers<[1], [0], [0], [1], [0, 0, 1, 1], [], []>} : vector<32x3xbf16>, vector<3x8xbf16>, vector<32x8xf32> -> vector<32x8xf32>
    %12 = arith.addf %8, %11 : vector<32x8xf32>
    %cst_16 = arith.constant dense<0.000000e+00> : vector<32x3xf32>
    %13 = tpu.matmul %2, %10, %cst_16 {dimension_numbers = #tpu.dot_dimension_numbers<[1], [0], [0], [1], [0, 0, 1, 1], [], []>} : vector<32x32xbf16>, vector<32x3xbf16>, vector<32x3xf32> -> vector<32x3xf32>
    %cst_17 = arith.constant 2.000000e+00 : f32
    %14 = vector.broadcast %cst_17 : f32 to vector<32x3xf32>
    %15 = arith.mulf %14, %13 : vector<32x3xf32>
    %16 = arith.extf %1 : vector<32x3xbf16> to vector<32x3xf32>
    %17 = arith.subf %15, %16 : vector<32x3xf32>
    %18 = arith.truncf %17 : vector<32x3xf32> to vector<32x3xbf16>
    %cst_18 = arith.constant dense<0.000000e+00> : vector<32x8xf32>
    %19 = tpu.matmul %18, %5, %cst_18 {dimension_numbers = #tpu.dot_dimension_numbers<[1], [0], [0], [1], [0, 0, 1, 1], [], []>} : vector<32x3xbf16>, vector<3x8xbf16>, vector<32x8xf32> -> vector<32x8xf32>
    %20 = arith.addf %12, %19 : vector<32x8xf32>
    %21 = vector.broadcast %6 : vector<1x8xf32> to vector<32x8xf32>
    %22 = arith.addf %20, %21 : vector<32x8xf32>
    %cst_19 = arith.constant 0.000000e+00 : f32
    %23 = vector.broadcast %cst_19 : f32 to vector<32x8xf32>
    %24 = arith.maximumf %22, %23 : vector<32x8xf32>
    %25 = arith.truncf %24 : vector<32x8xf32> to vector<32x8xbf16>
    %cst_20 = arith.constant dense<0.000000e+00> : vector<16x8xf32>
    %26 = tpu.matmul %7, %25, %cst_20 {dimension_numbers = #tpu.dot_dimension_numbers<[1], [0], [0], [1], [0, 0, 1, 1], [], []>} : vector<16x32xbf16>, vector<32x8xbf16>, vector<16x8xf32> -> vector<16x8xf32>
    %27 = arith.truncf %26 : vector<16x8xf32> to vector<16x8xbf16>
    %c0_21 = arith.constant 0 : index
    %c0_22 = arith.constant 0 : index
    %28 = vector.load %arg8[%c0_21, %c0_22] : memref<16x16xbf16, #tpu.memory_space<vmem>>, vector<16x16xbf16>
    %c0_23 = arith.constant 0 : index
    %c0_24 = arith.constant 0 : index
    %29 = vector.load %arg9[%c0_23, %c0_24] : memref<8x16xbf16, #tpu.memory_space<vmem>>, vector<8x16xbf16>
    %c0_25 = arith.constant 0 : index
    %c0_26 = arith.constant 0 : index
    %30 = vector.load %arg10[%c0_25, %c0_26] : memref<8x16xbf16, #tpu.memory_space<vmem>>, vector<8x16xbf16>
    %c0_27 = arith.constant 0 : index
    %c0_28 = arith.constant 0 : index
    %31 = vector.load %arg11[%c0_27, %c0_28] : memref<8x16xbf16, #tpu.memory_space<vmem>>, vector<8x16xbf16>
    %c0_29 = arith.constant 0 : index
    %c0_30 = arith.constant 0 : index
    %32 = vector.load %arg12[%c0_29, %c0_30] : memref<1x16xf32, #tpu.memory_space<vmem>>, vector<1x16xf32>
    %c0_31 = arith.constant 0 : index
    %c0_32 = arith.constant 0 : index
    %33 = vector.load %arg13[%c0_31, %c0_32] : memref<8x16xbf16, #tpu.memory_space<vmem>>, vector<8x16xbf16>
    %cst_33 = arith.constant dense<0.000000e+00> : vector<16x16xf32>
    %34 = tpu.matmul %27, %29, %cst_33 {dimension_numbers = #tpu.dot_dimension_numbers<[1], [0], [0], [1], [0, 0, 1, 1], [], []>} : vector<16x8xbf16>, vector<8x16xbf16>, vector<16x16xf32> -> vector<16x16xf32>
    %cst_34 = arith.constant dense<0.000000e+00> : vector<16x8xf32>
    %35 = tpu.matmul %28, %27, %cst_34 {dimension_numbers = #tpu.dot_dimension_numbers<[1], [0], [0], [1], [0, 0, 1, 1], [], []>} : vector<16x16xbf16>, vector<16x8xbf16>, vector<16x8xf32> -> vector<16x8xf32>
    %36 = arith.truncf %35 : vector<16x8xf32> to vector<16x8xbf16>
    %cst_35 = arith.constant dense<0.000000e+00> : vector<16x16xf32>
    %37 = tpu.matmul %36, %30, %cst_35 {dimension_numbers = #tpu.dot_dimension_numbers<[1], [0], [0], [1], [0, 0, 1, 1], [], []>} : vector<16x8xbf16>, vector<8x16xbf16>, vector<16x16xf32> -> vector<16x16xf32>
    %38 = arith.addf %34, %37 : vector<16x16xf32>
    %cst_36 = arith.constant dense<0.000000e+00> : vector<16x8xf32>
    %39 = tpu.matmul %28, %36, %cst_36 {dimension_numbers = #tpu.dot_dimension_numbers<[1], [0], [0], [1], [0, 0, 1, 1], [], []>} : vector<16x16xbf16>, vector<16x8xbf16>, vector<16x8xf32> -> vector<16x8xf32>
    %cst_37 = arith.constant 2.000000e+00 : f32
    %40 = vector.broadcast %cst_37 : f32 to vector<16x8xf32>
    %41 = arith.mulf %40, %39 : vector<16x8xf32>
    %42 = arith.extf %27 : vector<16x8xbf16> to vector<16x8xf32>
    %43 = arith.subf %41, %42 : vector<16x8xf32>
    %44 = arith.truncf %43 : vector<16x8xf32> to vector<16x8xbf16>
    %cst_38 = arith.constant dense<0.000000e+00> : vector<16x16xf32>
    %45 = tpu.matmul %44, %31, %cst_38 {dimension_numbers = #tpu.dot_dimension_numbers<[1], [0], [0], [1], [0, 0, 1, 1], [], []>} : vector<16x8xbf16>, vector<8x16xbf16>, vector<16x16xf32> -> vector<16x16xf32>
    %46 = arith.addf %38, %45 : vector<16x16xf32>
    %47 = vector.broadcast %32 : vector<1x16xf32> to vector<16x16xf32>
    %48 = arith.addf %46, %47 : vector<16x16xf32>
    %cst_39 = arith.constant 0.000000e+00 : f32
    %49 = vector.broadcast %cst_39 : f32 to vector<16x16xf32>
    %50 = arith.maximumf %48, %49 : vector<16x16xf32>
    %51 = arith.truncf %50 : vector<16x16xf32> to vector<16x16xbf16>
    %cst_40 = arith.constant dense<0.000000e+00> : vector<8x16xf32>
    %52 = tpu.matmul %33, %51, %cst_40 {dimension_numbers = #tpu.dot_dimension_numbers<[1], [0], [0], [1], [0, 0, 1, 1], [], []>} : vector<8x16xbf16>, vector<16x16xbf16>, vector<8x16xf32> -> vector<8x16xf32>
    %53 = arith.truncf %52 : vector<8x16xf32> to vector<8x16xbf16>
    %c0_41 = arith.constant 0 : index
    %c0_42 = arith.constant 0 : index
    %54 = vector.load %arg14[%c0_41, %c0_42] : memref<128x16xbf16, #tpu.memory_space<vmem>>, vector<128x16xbf16>
    %c0_43 = arith.constant 0 : index
    %c0_44 = arith.constant 0 : index
    %55 = vector.load %arg15[%c0_43, %c0_44] : memref<1x16xf32, #tpu.memory_space<vmem>>, vector<1x16xf32>
    %c0_45 = arith.constant 0 : index
    %c0_46 = arith.constant 0 : index
    %56 = vector.load %arg16[%c0_45, %c0_46] : memref<16x128xbf16, #tpu.memory_space<vmem>>, vector<16x128xbf16>
    %c0_47 = arith.constant 0 : index
    %c0_48 = arith.constant 0 : index
    %57 = vector.load %arg17[%c0_47, %c0_48] : memref<1x128xf32, #tpu.memory_space<vmem>>, vector<1x128xf32>
    %58 = vector.extract_strided_slice %53 {offsets = [0, 0], sizes = [1, 16], strides = [1, 1]} : vector<8x16xbf16> to vector<1x16xbf16>
    %59 = vector.extract_strided_slice %54 {offsets = [0, 0], sizes = [16, 16], strides = [1, 1]} : vector<128x16xbf16> to vector<16x16xbf16>
    %cst_49 = arith.constant dense<0.000000e+00> : vector<1x16xf32>
    %60 = tpu.matmul %58, %59, %cst_49 {dimension_numbers = #tpu.dot_dimension_numbers<[1], [0], [0], [1], [0, 0, 1, 1], [], []>} : vector<1x16xbf16>, vector<16x16xbf16>, vector<1x16xf32> -> vector<1x16xf32>
    %61 = arith.addf %55, %60 : vector<1x16xf32>
    %62 = vector.extract_strided_slice %53 {offsets = [1, 0], sizes = [1, 16], strides = [1, 1]} : vector<8x16xbf16> to vector<1x16xbf16>
    %63 = vector.extract_strided_slice %54 {offsets = [16, 0], sizes = [16, 16], strides = [1, 1]} : vector<128x16xbf16> to vector<16x16xbf16>
    %cst_50 = arith.constant dense<0.000000e+00> : vector<1x16xf32>
    %64 = tpu.matmul %62, %63, %cst_50 {dimension_numbers = #tpu.dot_dimension_numbers<[1], [0], [0], [1], [0, 0, 1, 1], [], []>} : vector<1x16xbf16>, vector<16x16xbf16>, vector<1x16xf32> -> vector<1x16xf32>
    %65 = arith.addf %61, %64 : vector<1x16xf32>
    %66 = vector.extract_strided_slice %53 {offsets = [2, 0], sizes = [1, 16], strides = [1, 1]} : vector<8x16xbf16> to vector<1x16xbf16>
    %67 = vector.extract_strided_slice %54 {offsets = [32, 0], sizes = [16, 16], strides = [1, 1]} : vector<128x16xbf16> to vector<16x16xbf16>
    %cst_51 = arith.constant dense<0.000000e+00> : vector<1x16xf32>
    %68 = tpu.matmul %66, %67, %cst_51 {dimension_numbers = #tpu.dot_dimension_numbers<[1], [0], [0], [1], [0, 0, 1, 1], [], []>} : vector<1x16xbf16>, vector<16x16xbf16>, vector<1x16xf32> -> vector<1x16xf32>
    %69 = arith.addf %65, %68 : vector<1x16xf32>
    %70 = vector.extract_strided_slice %53 {offsets = [3, 0], sizes = [1, 16], strides = [1, 1]} : vector<8x16xbf16> to vector<1x16xbf16>
    %71 = vector.extract_strided_slice %54 {offsets = [48, 0], sizes = [16, 16], strides = [1, 1]} : vector<128x16xbf16> to vector<16x16xbf16>
    %cst_52 = arith.constant dense<0.000000e+00> : vector<1x16xf32>
    %72 = tpu.matmul %70, %71, %cst_52 {dimension_numbers = #tpu.dot_dimension_numbers<[1], [0], [0], [1], [0, 0, 1, 1], [], []>} : vector<1x16xbf16>, vector<16x16xbf16>, vector<1x16xf32> -> vector<1x16xf32>
    %73 = arith.addf %69, %72 : vector<1x16xf32>
    %74 = vector.extract_strided_slice %53 {offsets = [4, 0], sizes = [1, 16], strides = [1, 1]} : vector<8x16xbf16> to vector<1x16xbf16>
    %75 = vector.extract_strided_slice %54 {offsets = [64, 0], sizes = [16, 16], strides = [1, 1]} : vector<128x16xbf16> to vector<16x16xbf16>
    %cst_53 = arith.constant dense<0.000000e+00> : vector<1x16xf32>
    %76 = tpu.matmul %74, %75, %cst_53 {dimension_numbers = #tpu.dot_dimension_numbers<[1], [0], [0], [1], [0, 0, 1, 1], [], []>} : vector<1x16xbf16>, vector<16x16xbf16>, vector<1x16xf32> -> vector<1x16xf32>
    %77 = arith.addf %73, %76 : vector<1x16xf32>
    %78 = vector.extract_strided_slice %53 {offsets = [5, 0], sizes = [1, 16], strides = [1, 1]} : vector<8x16xbf16> to vector<1x16xbf16>
    %79 = vector.extract_strided_slice %54 {offsets = [80, 0], sizes = [16, 16], strides = [1, 1]} : vector<128x16xbf16> to vector<16x16xbf16>
    %cst_54 = arith.constant dense<0.000000e+00> : vector<1x16xf32>
    %80 = tpu.matmul %78, %79, %cst_54 {dimension_numbers = #tpu.dot_dimension_numbers<[1], [0], [0], [1], [0, 0, 1, 1], [], []>} : vector<1x16xbf16>, vector<16x16xbf16>, vector<1x16xf32> -> vector<1x16xf32>
    %81 = arith.addf %77, %80 : vector<1x16xf32>
    %82 = vector.extract_strided_slice %53 {offsets = [6, 0], sizes = [1, 16], strides = [1, 1]} : vector<8x16xbf16> to vector<1x16xbf16>
    %83 = vector.extract_strided_slice %54 {offsets = [96, 0], sizes = [16, 16], strides = [1, 1]} : vector<128x16xbf16> to vector<16x16xbf16>
    %cst_55 = arith.constant dense<0.000000e+00> : vector<1x16xf32>
    %84 = tpu.matmul %82, %83, %cst_55 {dimension_numbers = #tpu.dot_dimension_numbers<[1], [0], [0], [1], [0, 0, 1, 1], [], []>} : vector<1x16xbf16>, vector<16x16xbf16>, vector<1x16xf32> -> vector<1x16xf32>
    %85 = arith.addf %81, %84 : vector<1x16xf32>
    %86 = vector.extract_strided_slice %53 {offsets = [7, 0], sizes = [1, 16], strides = [1, 1]} : vector<8x16xbf16> to vector<1x16xbf16>
    %87 = vector.extract_strided_slice %54 {offsets = [112, 0], sizes = [16, 16], strides = [1, 1]} : vector<128x16xbf16> to vector<16x16xbf16>
    %cst_56 = arith.constant dense<0.000000e+00> : vector<1x16xf32>
    %88 = tpu.matmul %86, %87, %cst_56 {dimension_numbers = #tpu.dot_dimension_numbers<[1], [0], [0], [1], [0, 0, 1, 1], [], []>} : vector<1x16xbf16>, vector<16x16xbf16>, vector<1x16xf32> -> vector<1x16xf32>
    %89 = arith.addf %85, %88 : vector<1x16xf32>
    %cst_57 = arith.constant 0.000000e+00 : f32
    %90 = vector.broadcast %cst_57 : f32 to vector<1x16xf32>
    %91 = arith.maximumf %89, %90 : vector<1x16xf32>
    %92 = arith.truncf %91 : vector<1x16xf32> to vector<1x16xbf16>
    %cst_58 = arith.constant dense<0.000000e+00> : vector<1x128xf32>
    %93 = tpu.matmul %92, %56, %cst_58 {dimension_numbers = #tpu.dot_dimension_numbers<[1], [0], [0], [1], [0, 0, 1, 1], [], []>} : vector<1x16xbf16>, vector<16x128xbf16>, vector<1x128xf32> -> vector<1x128xf32>
    %94 = arith.addf %93, %57 : vector<1x128xf32>
    %c0_59 = arith.constant 0 : index
    %c0_60 = arith.constant 0 : index
    %c0_61 = arith.constant 0 : index
    %95 = vector.load %arg18[%c0_59, %c0_60, %c0_61] : memref<1x1x128xf32, #tpu.memory_space<vmem>>, vector<1x1x128xf32>
    %96 = vector.shape_cast %95 : vector<1x1x128xf32> to vector<1x128xf32>
    %97 = vector.shape_cast %94 : vector<1x128xf32> to vector<1x1x128xf32>
    tpu.vector_store %arg18[%c0_59, %c0_60, %c0_61], %97 {strides = array<i32>} : memref<1x1x128xf32, #tpu.memory_space<vmem>>, vector<1x1x128xf32>,
    return
  }
  func.func @transform_0(%arg0: i32) -> (i32, i32, i32) {
    %c0_i32 = arith.constant 0 : i32
    %c0_i32_0 = arith.constant 0 : i32
    %c0_i32_1 = arith.constant 0 : i32
    return %arg0, %c0_i32, %c0_i32_0 : i32, i32, i32
  }
  func.func @transform_1(%arg0: i32) -> (i32, i32) {
    %c0_i32 = arith.constant 0 : i32
    %c0_i32_0 = arith.constant 0 : i32
    %c0_i32_1 = arith.constant 0 : i32
    return %c0_i32, %c0_i32_0 : i32, i32
  }
  func.func @transform_2(%arg0: i32) -> (i32, i32) {
    %c0_i32 = arith.constant 0 : i32
    %c0_i32_0 = arith.constant 0 : i32
    %c0_i32_1 = arith.constant 0 : i32
    return %c0_i32, %c0_i32_0 : i32, i32
  }
  func.func @transform_3(%arg0: i32) -> (i32, i32) {
    %c0_i32 = arith.constant 0 : i32
    %c0_i32_0 = arith.constant 0 : i32
    %c0_i32_1 = arith.constant 0 : i32
    return %c0_i32, %c0_i32_0 : i32, i32
  }
  func.func @transform_4(%arg0: i32) -> (i32, i32) {
    %c0_i32 = arith.constant 0 : i32
    %c0_i32_0 = arith.constant 0 : i32
    %c0_i32_1 = arith.constant 0 : i32
    return %c0_i32, %c0_i32_0 : i32, i32
  }
  func.func @transform_5(%arg0: i32) -> (i32, i32) {
    %c0_i32 = arith.constant 0 : i32
    %c0_i32_0 = arith.constant 0 : i32
    %c0_i32_1 = arith.constant 0 : i32
    return %c0_i32, %c0_i32_0 : i32, i32
  }
  func.func @transform_6(%arg0: i32) -> (i32, i32) {
    %c0_i32 = arith.constant 0 : i32
    %c0_i32_0 = arith.constant 0 : i32
    %c0_i32_1 = arith.constant 0 : i32
    return %c0_i32, %c0_i32_0 : i32, i32
  }
  func.func @transform_7(%arg0: i32) -> (i32, i32) {
    %c0_i32 = arith.constant 0 : i32
    %c0_i32_0 = arith.constant 0 : i32
    %c0_i32_1 = arith.constant 0 : i32
    return %c0_i32, %c0_i32_0 : i32, i32
  }
  func.func @transform_8(%arg0: i32) -> (i32, i32) {
    %c0_i32 = arith.constant 0 : i32
    %c0_i32_0 = arith.constant 0 : i32
    %c0_i32_1 = arith.constant 0 : i32
    return %c0_i32, %c0_i32_0 : i32, i32
  }
  func.func @transform_9(%arg0: i32) -> (i32, i32) {
    %c0_i32 = arith.constant 0 : i32
    %c0_i32_0 = arith.constant 0 : i32
    %c0_i32_1 = arith.constant 0 : i32
    return %c0_i32, %c0_i32_0 : i32, i32
  }
  func.func @transform_10(%arg0: i32) -> (i32, i32) {
    %c0_i32 = arith.constant 0 : i32
    %c0_i32_0 = arith.constant 0 : i32
    %c0_i32_1 = arith.constant 0 : i32
    return %c0_i32, %c0_i32_0 : i32, i32
  }
  func.func @transform_11(%arg0: i32) -> (i32, i32) {
    %c0_i32 = arith.constant 0 : i32
    %c0_i32_0 = arith.constant 0 : i32
    %c0_i32_1 = arith.constant 0 : i32
    return %c0_i32, %c0_i32_0 : i32, i32
  }
  func.func @transform_12(%arg0: i32) -> (i32, i32) {
    %c0_i32 = arith.constant 0 : i32
    %c0_i32_0 = arith.constant 0 : i32
    %c0_i32_1 = arith.constant 0 : i32
    return %c0_i32, %c0_i32_0 : i32, i32
  }
  func.func @transform_13(%arg0: i32) -> (i32, i32) {
    %c0_i32 = arith.constant 0 : i32
    %c0_i32_0 = arith.constant 0 : i32
    %c0_i32_1 = arith.constant 0 : i32
    return %c0_i32, %c0_i32_0 : i32, i32
  }
  func.func @transform_14(%arg0: i32) -> (i32, i32) {
    %c0_i32 = arith.constant 0 : i32
    %c0_i32_0 = arith.constant 0 : i32
    %c0_i32_1 = arith.constant 0 : i32
    return %c0_i32, %c0_i32_0 : i32, i32
  }
  func.func @transform_15(%arg0: i32) -> (i32, i32) {
    %c0_i32 = arith.constant 0 : i32
    %c0_i32_0 = arith.constant 0 : i32
    %c0_i32_1 = arith.constant 0 : i32
    return %c0_i32, %c0_i32_0 : i32, i32
  }
  func.func @transform_16(%arg0: i32) -> (i32, i32) {
    %c0_i32 = arith.constant 0 : i32
    %c0_i32_0 = arith.constant 0 : i32
    %c0_i32_1 = arith.constant 0 : i32
    return %c0_i32, %c0_i32_0 : i32, i32
  }
  func.func @transform_17(%arg0: i32) -> (i32, i32, i32) {
    %c0_i32 = arith.constant 0 : i32
    %c0_i32_0 = arith.constant 0 : i32
    %c0_i32_1 = arith.constant 0 : i32
    return %arg0, %c0_i32, %c0_i32_0 : i32, i32, i32
  }
}

</mosaic_0001>

<bundles_post_ra>
// kernel: forward.1
= control target key start
LH: loop header
LB: loop body
LE: loop exit
PB: predicated region body
PF: predicated region fallthrough
CT: control target
= control target key end

     0   :  { %s3165_s0 = inlined_call_operand.vmem [shape: bf16[2,32,3], index: 0, kind: input, shape index: {}]   ;;  %s3166_s1 = inlined_call_operand.vmem [shape: bf16[32,32], index: 1, kind: input, shape index: {}]   ;;  %s3167_s2 = inlined_call_operand.hbm [shape: bf16[3,8], index: 2, kind: input, shape index: {}]   ;;  %s3168_s3 = inlined_call_operand.hbm [shape: bf16[3,8], index: 3, kind: input, shape index: {}]   ;;  %s3169_s4 = inlined_call_operand.vmem [shape: bf16[3,8], index: 4, kind: input, shape index: {}]   ;;  %s3170_s5 = inlined_call_operand.hbm [shape: f32[1,8], index: 5, kind: input, shape index: {}]   ;;  %s3171_s6 = inlined_call_operand.vmem [shape: bf16[16,32], index: 6, kind: input, shape index: {}]   ;;  %s3172_s7 = inlined_call_operand.vmem [shape: bf16[16,16], index: 7, kind: input, shape index: {}]   ;;  %s3173_s8 = inlined_call_operand.hbm [shape: bf16[8,16], index: 8, kind: input, shape index: {}]   ;;  %s3174_s9 = inlined_call_operand.hbm [shape: bf16[8,16], index: 9, kind: input, shape index: {}]   ;;  %s3175_s10 = inlined_call_operand.vmem [shape: bf16[8,16], index: 10, kind: input, shape index: {}]   ;;  %s3176_s11 = inlined_call_operand.hbm [shape: f32[1,16], index: 11, kind: input, shape index: {}]   ;;  %s3177_s12 = inlined_call_operand.vmem [shape: bf16[8,16], index: 12, kind: input, shape index: {}]   ;;  %s3178_s13 = inlined_call_operand.vmem [shape: bf16[128,16], index: 13, kind: input, shape index: {}]   ;;  %s3179_s14 = inlined_call_operand.hbm [shape: f32[1,16], index: 14, kind: input, shape index: {}]   ;;  %s3180_s15 = inlined_call_operand.vmem [shape: bf16[16,128], index: 15, kind: input, shape index: {}]   ;;  %s3181_s16 = inlined_call_operand.vmem [shape: f32[1,128], index: 16, kind: input, shape index: {}]   ;;  %s3182_s17 = inlined_call_operand.hbm [shape: f32[2,1,128], index: 17, kind: output, shape index: {}]  }
   0x1   :  { %3196 = sst [smem:[#allocation27_spill]] %s3165_s0 }
   0x2   :  { %3197 = sst [smem:[#allocation28_spill]] %s3166_s1 }
   0x3   :  { %3198 = sst [smem:[#allocation29_spill]] %s3168_s3 }
   0x4   :  { %3199 = sst [smem:[#allocation30_spill]] %s3181_s16 }
   0x5   :  { %3200 = sst [smem:[#allocation31_spill]] %s3182_s17 }
   0x6   :  { %22 = vsyncpa [#allocation3], 0 }
   0x7   :  { %23 = vsyncpa [#allocation6], 0 }
   0x8   :  { %24 = vsyncpa [#allocation9], 0 }
   0x9   :  { %25 = vsyncpa [#allocation12], 0 }
   0xa   :  { %26 = vsyncpa [#allocation4], 0 }
   0xb   :  { %28 = vsyncpa [#allocation4 + $0x1], 0  ;;  %s2758_s24 = smov 0   ;;  %s2760_s25 = smov 0  }
   0xc   :  { %s2762_s26 = smov 0   ;;  %s2764_s27 = smov 0  }
   0xd LB: > { %3201 = sst [smem:[#allocation20_spill]] %s2643_s24  ;;  %s2779_s28 = sadd.s32 4294967295, %s2655_s27   ;;  %s2655_s27 = sphi %s2764_s27, %s3233_s27   ;;  %s2651_s26 = sphi %s2762_s26, %s3235_s26   ;;  %s2647_s25 = sphi %s2760_s25, %s3237_s25   ;;  %s2643_s24 = sphi %s2758_s24, %s3236_s24  }
   0xe   : > { %3202 = sst [smem:[#allocation21_spill]] %s2651_s26  ;;  %s1965_s29 = sadd.s32 4294967294, %s2655_s27  }
   0xf   : > { %3203 = sst [smem:[#allocation22_spill]] %s2655_s27  ;;  %s2783_s0 = sadd.s32 1, %s2655_s27  }
  0x10   : > { %3204 = sst [smem:[#allocation23_spill]] %s2783_s0  ;;  %s403_s30 = sadd.s32 1, %s2651_s26 }
  0x11   : > { %s400_s18 = ssub.s32 %s2655_s27, %s2783_s0  ;;  %p413_p0 = scmp.ne.s32.totalorder %s2651_s26, %s2647_s25 }
  0x12   : > { %p401_p1 = scmp.eq.s32.totalorder %s400_s18, 0  ;;  %p414_p2 = scmp.eq.s32.totalorder %s2779_s28, 1 }
  0x13   : > { %p419_p3 = scmp.ne.s32.totalorder %s2647_s25, %s2643_s24  ;;  %p420_p4 = scmp.eq.s32.totalorder %s1965_s29, 1 }
  0x14   : > { %s2794_s19 = scalar_select %p401_p1, %s2651_s26, %s403_s30  }
  0x15   : > { %p2796_p5 = por %p414_p2, %p413_p0  ;;  %p2800_p6 = por %p420_p4, %p419_p3 }
  0x16   : > { %3205 = sst [smem:[#allocation24_spill]] %s2794_s19  ;;  %p1966_p7 = scmp.ge.s32.totalorder %s2655_s27, 1 }
  0x17   : > { %s3206_s1 = scalar_select %p2796_p5, 1, 0 }
  0x18   : > { %s3208_s20 = scalar_select %p2800_p6, 1, 0 }
  0x19   : > { %3207 = sst [smem:[#allocation25_spill]] %s3206_s1  ;;  %p427_p8 = scmp.lt.s32.totalorder %s2655_s27, 3 }
  0x1a   : > { %3209 = sst [smem:[#allocation26_spill]] %s3208_s20  ;;  %p3191_p9 = scmp.eq.s32.totalorder %s2779_s28, 0 }
  0x1b   : > { %p2807_p10 = pnand %p1966_p7, %p427_p8  ;;  %s2657_s22 = smov [#allocation5]  }
  0x1c   : > { %s454_s23 = sshll.u32 %s2657_s22, 4  ;;  %s2658_s29 = smov [#allocation8]   ;;  %s455_s23 = int_to_ptr.vmem [resolvable:$true] %s454_s23 }
  0x1d   : > { %s3210_s21 = scalar_select %p2807_p10, 1, 0 }
  0x1e   : > { %p2281_p11 = pneg %p2807_p10  ;;  %s485_s30 = sshll.u32 %s2658_s29, 4  ;;  %s2819_s30 = int_to_ptr.vmem [resolvable:$true] %s485_s30 }
  0x1f   : > { %s2659_s19 = smov [#allocation11]   ;;  %s3212_s3 = sld [smem:[#allocation29_spill]] }
  0x20   : > { %p2815_p12 = pnand %p3191_p9, %p2281_p11  ;;  %s510_s26 = sshll.u32 %s2659_s19, 4  ;;  %s2821_s26 = int_to_ptr.vmem [resolvable:$true] %s510_s26 }
  0x22   : > { %p2831_p0 = pneg %p2815_p12 }
  0x25   : > { %s2381_s22 = scalar_lea.hbm %s3212_s3, 32 }
  0x26   : > { %p2382_p13 = scmp.ne.s32.totalorder %s3212_s3, %s2381_s22  ;;  %p2388_p3 = scmp.lt.u32.totalorder %s2381_s22, %s3212_s3 }
  0x28   : > { %p2384_p1 = pnand %p2831_p0, %p2382_p13 }
  0x2a   : > { %p2385_p2 = pneg %p2384_p1 }
  0x2c   : > { %p2390_p4 = pnand %p2388_p3, %p2385_p2 }
  0x2e   : > { %2393 = shalt.err (!%p2390_p4)
}
  0x2f   : > { %s2394_s0 = scalar_lea.vmem %s455_s23, 32  ;;  %p2402_p9 = scmp.lt.s32.totalorder %s455_s23, %s455_s23 }
  0x30   : > { %p2395_p7 = scmp.ne.s32.totalorder %s455_s23, %s2394_s0  ;;  %p2403_p6 = scmp.lt.s32.totalorder %s2394_s0, %s2394_s0 }
  0x32   : > { %p2397_p8 = pnand %p2395_p7, %p2831_p0  ;;  %p2404_p5 = por %p2403_p6, %p2402_p9 }
  0x34   : > { %p2398_p11 = pneg %p2397_p8 }
  0x36   : > { %p2405_p10 = pnand %p2404_p5, %p2398_p11 }
  0x38   : > { %2408 = shalt.err (!%p2405_p10)
}
  0x39   : > { %2287 = dma.hbm_to_vmem [thread:$0]  (!%p2815_p12), %s3212_s3, 32, %s455_s23, [#allocation6]  }
  0x3a   : > { %s2409_s22 = scalar_lea.hbm %s3173_s8, 64 }
  0x3b   : > { %p2410_p13 = scmp.ne.s32.totalorder %s3173_s8, %s2409_s22  ;;  %p2416_p5 = scmp.lt.u32.totalorder %s2409_s22, %s3173_s8 }
  0x3d   : > { %p2412_p1 = pnand %p2410_p13, %p2831_p0 }
  0x3f   : > { %p2413_p6 = pneg %p2412_p1 }
  0x41   : > { %p2418_p9 = pnand %p2416_p5, %p2413_p6 }
  0x43   : > { %2421 = shalt.err (!%p2418_p9)
}
  0x44   : > { %s2422_s23 = scalar_lea.vmem %s2819_s30, 64  ;;  %p2430_p4 = scmp.lt.s32.totalorder %s2819_s30, %s2819_s30 }
  0x45   : > { %p2423_p10 = scmp.ne.s32.totalorder %s2819_s30, %s2422_s23  ;;  %p2431_p7 = scmp.lt.s32.totalorder %s2422_s23, %s2422_s23 }
  0x47   : > { %p2425_p2 = pnand %p2423_p10, %p2831_p0  ;;  %p2432_p8 = por %p2431_p7, %p2430_p4 }
  0x49   : > { %p2426_p3 = pneg %p2425_p2 }
  0x4b   : > { %p2433_p11 = pnand %p2432_p8, %p2426_p3 }
  0x4d   : > { %2436 = shalt.err (!%p2433_p11)
}
  0x4e   : > { %2293 = dma.hbm_to_vmem [thread:$0]  (!%p2815_p12), %s3173_s8, 64, %s2819_s30, [#allocation9]  }
  0x4f   : > { %s2437_s17 = scalar_lea.hbm %s3176_s11, 16 }
  0x50   : > { %p2438_p13 = scmp.ne.s32.totalorder %s3176_s11, %s2437_s17  ;;  %p2444_p5 = scmp.lt.u32.totalorder %s2437_s17, %s3176_s11 }
  0x52   : > { %p2440_p1 = pnand %p2438_p13, %p2831_p0 }
  0x54   : > { %p2441_p6 = pneg %p2440_p1 }
  0x56   : > { %p2446_p9 = pnand %p2444_p5, %p2441_p6 }
  0x58   : > { %2449 = shalt.err (!%p2446_p9)
}
  0x59   : > { %s2450_s30 = scalar_lea.vmem %s2821_s26, 16  ;;  %s2457_s23 = scalar_lea.vmem %s2821_s26, 32 }
  0x5a   : > { %p2451_p10 = scmp.ne.s32.totalorder %s2821_s26, %s2450_s30  ;;  %p2458_p4 = scmp.lt.s32.totalorder %s2821_s26, %s2821_s26 }
  0x5b   : > { %p2459_p7 = scmp.lt.s32.totalorder %s2457_s23, %s2450_s30 }
  0x5c   : > { %p2453_p2 = pnand %p2451_p10, %p2831_p0 }
  0x5d   : > { %p2460_p8 = por %p2459_p7, %p2458_p4 }
  0x5e   : > { %p2454_p3 = pneg %p2453_p2 }
  0x60   : > { %p2461_p11 = pnand %p2460_p8, %p2454_p3 }
  0x62   : > { %2464 = shalt.err (!%p2461_p11)
}
  0x63   : > { %2299 = dma.hbm_to_vmem [thread:$0]  (!%p2815_p12), %s3176_s11, 16, %s2821_s26, [#allocation12]  }
  0x64   : > { %s2660_s24 = smov [#allocation2]   ;;  %s2661_s17 = smov [#allocation7]  }
  0x65   : > { %s443_s27 = sshll.u32 %s2660_s24, 4  ;;  %s468_s20 = sshll.u32 %s2661_s17, 4  ;;  %s444_s27 = int_to_ptr.vmem [resolvable:$true] %s443_s27  ;;  %s469_s20 = int_to_ptr.vmem [resolvable:$true] %s468_s20 }
  0x66   : > { %s2465_s0 = scalar_lea.hbm %s3167_s2, 32 }
  0x67   : > { %p2466_p13 = scmp.ne.s32.totalorder %s3167_s2, %s2465_s0  ;;  %p2472_p5 = scmp.lt.u32.totalorder %s2465_s0, %s3167_s2 }
  0x69   : > { %p2468_p1 = pnand %p2466_p13, %p2831_p0 }
  0x6b   : > { %p2469_p6 = pneg %p2468_p1 }
  0x6d   : > { %p2474_p9 = pnand %p2472_p5, %p2469_p6 }
  0x6f   : > { %2477 = shalt.err (!%p2474_p9)
}
  0x70   : > { %s2478_s26 = scalar_lea.vmem %s444_s27, 32  ;;  %p2486_p4 = scmp.lt.s32.totalorder %s444_s27, %s444_s27 }
  0x71   : > { %p2479_p10 = scmp.ne.s32.totalorder %s444_s27, %s2478_s26  ;;  %p2487_p7 = scmp.lt.s32.totalorder %s2478_s26, %s2478_s26 }
  0x73   : > { %p2481_p2 = pnand %p2479_p10, %p2831_p0  ;;  %p2488_p8 = por %p2487_p7, %p2486_p4 }
  0x75   : > { %p2482_p3 = pneg %p2481_p2 }
  0x77   : > { %p2489_p11 = pnand %p2488_p8, %p2482_p3 }
  0x79   : > { %2492 = shalt.err (!%p2489_p11)
}
  0x7a   : > { %2284 = dma.hbm_to_vmem [thread:$0]  (!%p2815_p12), %s3167_s2, 32, %s444_s27, [#allocation3]  }
  0x7b   : > { %s2493_s22 = scalar_lea.hbm %s3170_s5, 16 }
  0x7c   : > { %p2494_p13 = scmp.ne.s32.totalorder %s3170_s5, %s2493_s22  ;;  %p2500_p5 = scmp.lt.u32.totalorder %s2493_s22, %s3170_s5 }
  0x7e   : > { %p2496_p1 = pnand %p2494_p13, %p2831_p0 }
  0x80   : > { %p2497_p6 = pneg %p2496_p1 }
  0x82   : > { %p2502_p9 = pnand %p2500_p5, %p2497_p6 }
  0x84   : > { %2505 = shalt.err (!%p2502_p9)
}
  0x85   : > { %s2506_s16 = scalar_lea.vmem %s469_s20, 16  ;;  %s2513_s27 = scalar_lea.vmem %s469_s20, 32 }
  0x86   : > { %p2507_p10 = scmp.ne.s32.totalorder %s469_s20, %s2506_s16  ;;  %p2514_p4 = scmp.lt.s32.totalorder %s469_s20, %s469_s20 }
  0x87   : > { %p2515_p7 = scmp.lt.s32.totalorder %s2513_s27, %s2506_s16 }
  0x88   : > { %p2509_p2 = pnand %p2507_p10, %p2831_p0 }
  0x89   : > { %p2516_p8 = por %p2515_p7, %p2514_p4 }
  0x8a   : > { %p2510_p3 = pneg %p2509_p2 }
  0x8c   : > { %p2517_p11 = pnand %p2516_p8, %p2510_p3 }
  0x8e   : > { %2520 = shalt.err (!%p2517_p11)
}
  0x8f   : > { %2290 = dma.hbm_to_vmem [thread:$0]  (!%p2815_p12), %s3170_s5, 16, %s469_s20, [#allocation6]  }
  0x90   : > { %s2662_s24 = smov [#allocation10]   ;;  %s2663_s17 = smov [#allocation13]  }
  0x91   : > { %s496_s3 = sshll.u32 %s2662_s24, 4  ;;  %s527_s22 = sshll.u32 %s2663_s17, 4  ;;  %s497_s3 = int_to_ptr.vmem [resolvable:$true] %s496_s3  ;;  %s528_s22 = int_to_ptr.vmem [resolvable:$true] %s527_s22 }
  0x92   : > { %s2521_s30 = scalar_lea.hbm %s3174_s9, 64 }
  0x93   : > { %p2522_p13 = scmp.ne.s32.totalorder %s3174_s9, %s2521_s30  ;;  %p2528_p5 = scmp.lt.u32.totalorder %s2521_s30, %s3174_s9 }
  0x95   : > { %p2524_p1 = pnand %p2522_p13, %p2831_p0 }
  0x97   : > { %p2525_p6 = pneg %p2524_p1 }
  0x99   : > { %p2530_p9 = pnand %p2528_p5, %p2525_p6 }
  0x9b   : > { %2533 = shalt.err (!%p2530_p9)
}
  0x9c   : > { %s2534_s20 = scalar_lea.vmem %s497_s3, 64  ;;  %p2542_p4 = scmp.lt.s32.totalorder %s497_s3, %s497_s3 }
  0x9d   : > { %p2535_p10 = scmp.ne.s32.totalorder %s497_s3, %s2534_s20  ;;  %p2543_p7 = scmp.lt.s32.totalorder %s2534_s20, %s2534_s20 }
  0x9f   : > { %p2537_p2 = pnand %p2535_p10, %p2831_p0  ;;  %p2544_p8 = por %p2543_p7, %p2542_p4 }
  0xa1   : > { %p2538_p3 = pneg %p2537_p2 }
  0xa3   : > { %p2545_p11 = pnand %p2544_p8, %p2538_p3 }
  0xa5   : > { %2548 = shalt.err (!%p2545_p11)
}
  0xa6   : > { %2296 = dma.hbm_to_vmem [thread:$0]  (!%p2815_p12), %s3174_s9, 64, %s497_s3, [#allocation9]  }
  0xa7   : > { %s2549_s0 = scalar_lea.hbm %s3179_s14, 16 }
  0xa8   : > { %p2550_p13 = scmp.ne.s32.totalorder %s3179_s14, %s2549_s0  ;;  %p2556_p5 = scmp.lt.u32.totalorder %s2549_s0, %s3179_s14 }
  0xaa   : > { %p2552_p1 = pnand %p2550_p13, %p2831_p0 }
  0xac   : > { %p2553_p6 = pneg %p2552_p1 }
  0xae   : > { %p2558_p9 = pnand %p2556_p5, %p2553_p6 }
  0xb0   : > { %2561 = shalt.err (!%p2558_p9)
}
  0xb1   : > { %s2562_s26 = scalar_lea.vmem %s528_s22, 16  ;;  %s2569_s3 = scalar_lea.vmem %s528_s22, 32 }
  0xb2   : > { %p2563_p10 = scmp.ne.s32.totalorder %s528_s22, %s2562_s26  ;;  %p2570_p4 = scmp.lt.s32.totalorder %s528_s22, %s528_s22 }
  0xb3   : > { %p2571_p7 = scmp.lt.s32.totalorder %s2569_s3, %s2562_s26 }
  0xb4   : > { %p2565_p2 = pnand %p2563_p10, %p2831_p0 }
  0xb5   : > { %p2572_p8 = por %p2571_p7, %p2570_p4 }
  0xb6   : > { %p2566_p3 = pneg %p2565_p2 }
  0xb8   : > { %p2573_p11 = pnand %p2572_p8, %p2566_p3 }
  0xba   : > { %2576 = shalt.err (!%p2573_p11)
}
  0xbb   : > { %2302 = dma.hbm_to_vmem [thread:$0]  (!%p2815_p12), %s3179_s14, 16, %s528_s22, [#allocation12]  }
  0xbc   : > { %p3214_p13 = scmp.ne.s32.totalorder %s3210_s21, 0 }
  0xbd   : > { %p3215_p1 = scmp.eq.s32.totalorder (!%p3214_p13), %s2779_s28, 0 }
  0xbe   : > { %554 = sbr.rel (%p3214_p13) target bundleno = 2544 (0x9f0), region = 88 }
  0xc5   : > { %2622 = dma.done.wait (%p3215_p1), [#allocation3], 32   ;;  %p3216_p0 = pmov %p3215_p1 }
  0xc7   : > { %2624 = vsyncadd (%p3216_p0), [#allocation3], 4294967264  ;;  %p3217_p6 = pmov %p3216_p0 }
  0xc8   : > { %p3218_p5 = pmov %p3216_p0 }
  0xc9   : > { %2626 = dma.done.wait (%p3217_p6), [#allocation6], 48  }
  0xca   : > { %2628 = vsyncadd (%p3218_p5), [#allocation6], 4294967248  ;;  %p3219_p9 = pmov %p3216_p0 }
  0xcb   : > { %p3220_p12 = pmov %p3216_p0 }
  0xcc   : > { %2630 = dma.done.wait (%p3219_p9), [#allocation9], 128  }
  0xcd   : > { %2632 = vsyncadd (%p3220_p12), [#allocation9], 4294967168  ;;  %p3221_p10 = pmov %p3216_p0 }
  0xce   : > { %p3222_p2 = pmov %p3216_p0 }
  0xcf   : > { %2634 = dma.done.wait (%p3221_p10), [#allocation12], 32  }
  0xd0   : > { %2636 = vsyncadd (%p3222_p2), [#allocation12], 4294967264  ;;  %p629_p3 = scmp.lt.s32.totalorder %s2779_s28, 1  ;;  %s3223_s24 = sld [smem:[#allocation27_spill]]  ;;  %vm671_vm0 = vcmask 261120   ;;  %vm736_vm1 = vcmask 1040384  }
  0xd1   : > { %s3224_s30 = sld [smem:[#allocation28_spill]]  ;;  %vm737_vm2 = vcmask 1041408   ;;  %v2664_v4 = vmov 65535   ;;  %v644_v6 = vld [vmem:[#allocation5] sm:$0x3]  ;;  %vm729_vm3 = vcmask 23552  }
  0xd2   : > { %s630_s21 = scalar_select %p629_p3, %s2779_s28, 1  ;;  %v738_v5 = vsel %vm736_vm1, 4294967295, %v2664_v4  ;;  %v643_v9 = vld [vmem:[#allocation2] sm:$0x3]  ;;  %v2665_v37 = vmov 0.0   ;;  %vm2666_vm4 = vmmov 0  }
  0xd3   : > { %v739_v7 = vsel %vm737_vm2, %v738_v5, 0  ;;  %v645_v17 = vld [vmem:[%s3169_s4] sm:$0x3]  ;;  %2124 = vmatprep.subr.bf16.mxu1 %v2665_v37  ;;  %2126 = vmatprep.mubr.msk.bf16.mxu1 %vm2666_vm4, %v2665_v37  ;;  %v1999_v38 = vld [vmem:[#allocation7] ss:$0 sm:$0xff]  ;;  %vm1103_vm5 = vcmask 1043456  }
  0xd4   : > { %s2031_s18 = sshll.u32 %s630_s21, 4  ;;  %v741_v8 = vand.u32 %v739_v7, %v644_v6  ;;  %v799_v10 = vand.u32 %v739_v7, %v643_v9  ;;  %v920_v18 = vand.u32 %v739_v7, %v645_v17  ;;  %v2368_v53 = vld [vmem:[%s3171_s6] sm:$0xff]   ;;  %vm1053_vm6 = vcmask 130048   ;;  %v1044_v62 = vld [vmem:[#allocation10] sm:$0xf]  ;;  %s627_s23 = sand.u32 1, %s2647_s25  }
  0xd5   : > { %v1043_v59 = vld [vmem:[#allocation8] sm:$0xf]  ;;  %vm1099_vm7 = vcmask 64512   ;;  %v1105_v63 = vsel %vm1103_vm5, %v1044_v62, 0  ;;  %v1045_v9 = vld [vmem:[%s3175_s10] sm:$0xf] }
  0xd6   : > { %s633_s17 = scalar_lea.vmem %s3223_s24, %s2031_s18  ;;  %v2369_v60 = vld [vmem:[%s3172_s7] sm:$0xff]   ;;  %v1152_v61 = vsel %vm1103_vm5, %v1043_v59, 0  ;;  %v2377_v59 = vld [vmem:[%s3178_s13 + $0x38] sm:$0xff]   ;;  %s3225_s26 = sld [smem:[#allocation30_spill]] }
  0xd7   : > { %v635_v0 = vld [vmem:[%s633_s17] sm:$0xff]   ;;  %v637_v1 = vld [vmem:[%s633_s17 + $0x8] sm:$0xff]   ;;  %s3226_s3 = sld [smem:[#allocation25_spill]]  ;;  %s2028_s20 = sshll.u32 %s2779_s28, 4 }
  0xd8   : > { %v2366_v2 = vld [vmem:[%s3224_s30] sm:$0xff]   ;;  %2082 = vmatprep.subr.bf16.mxu0 %v635_v0  ;;  %v2367_v3 = vld [vmem:[%s3224_s30 + $0x8] sm:$0xff]   ;;  %v905_v21 = vunpack.c.l.bf16 %v637_v1  ;;  %v906_v23 = vunpack.c.h.bf16 %v637_v1  ;;  %v903_v25 = vunpack.c.l.bf16 %v635_v0  ;;  %v904_v27 = vunpack.c.h.bf16 %v635_v0  ;;  %s628_s1 = scalar_lea.vmem [#allocation14], %s627_s23  ;;  %s3227_s22 = sld [smem:[#allocation31_spill]] }
  0xd9   : > { %2086 = vmatprep.mubr.msk.bf16.mxu0 %vm671_vm0, %v2366_v2  ;;  %2083 = vmatpush3.bf16.msra.mxu0 %v635_v0  ;;  %v2378_v62 = vld [vmem:[%s3180_s15] sm:$0xff]   ;;  %s1841_s21 = sshll.u32 %s628_s1, 4  ;;  %s1829_s17 = scalar_lea.sflag [#allocation4], %s627_s23  ;;  %s3125_s21 = int_to_ptr.vmem [resolvable:$true] %s1841_s21 }
  0xda   : > { %2084 = vmatprep.subr.bf16.mxu0 %v637_v1  ;;  %s2577_s28 = scalar_lea.vmem %s3125_s21, 16  ;;  %s2667_s19 = smov [#allocation14]  }
  0xdb   : > { %p2578_p4 = scmp.ne.s32.totalorder %s3125_s21, %s2577_s28  ;;  %s2581_s0 = sshll.u32 %s2667_s19, 4  ;;  %s2582_s0 = int_to_ptr.vmem [resolvable:$false] %s2581_s0 }
  0xdc   : > { %s2583_s16 = scalar_lea.vmem %s2582_s0, 32  ;;  %p2584_p13 = scmp.lt.s32.totalorder %s3125_s21, %s2582_s0 }
  0xdd   : > { %2085 = vmatpush3.bf16.msra.mxu0 %v637_v1  ;;  %p3228_p7 = scmp.ne.s32.totalorder %s3226_s3, 0  ;;  %p2585_p1 = scmp.lt.s32.totalorder %s2583_s16, %s2577_s28 }
  0xde   : > { %2090 = vmatprep.subr.bf16.mxu0 %v741_v8  ;;  %s3123_s24 = scalar_lea.hbm %s3227_s22, %s2028_s20 }
  0xdf   : > { %p2579_p8 = pnand %p2578_p4, %p3228_p7  ;;  %p2586_p0 = por %p2585_p1, %p2584_p13 }
  0xe0   : > { %2087 = vmatmul.mubr.msk.bf16.vlgmr.msra.gmra.mrb[0].mxu0 %vm671_vm0, %v2367_v3 }
  0xe1   : > { %2091 = vmatpush3.bf16.msra.mxu0 %v741_v8  ;;  %p2580_p11 = pneg %p2579_p8 }
  0xe2   : > { %2096 = vmatprep.subr.bf16.mxu0 %v799_v10 }
  0xe3   : > { %p2587_p6 = pnand %p2586_p0, %p2580_p11 }
 0x1b3   : > { %v2088_v11 = vpop.f32.mrb[0].mxu0 }
 0x1b4   : > { %v712_v12 = vpop.f32.mrb[1].mxu0 }
 0x1b5   : > { %v2089_v13 = vpop.f32.mrb[2].mxu0 }
 0x1b6   : > { %v728_v14 = vpack.c.bf16 %v2089_v13, %v2088_v11  ;;  %v715_v15 = vpop.f32.mrb[3].mxu0 }
 0x1b7   : > { %v727_v16 = vpack.c.bf16 %v715_v15, %v712_v12 }
 0x1b9   : > { %2092 = vmatprep.mubr.msk.bf16.mxu0 %vm729_vm3, %v727_v16 }
 0x1ba   : > { %2093 = vmatmul.mubr.msk.bf16.vlgmr.msra.gmra.mrb[4].mxu0 %vm729_vm3, %v728_v14 }
 0x1bb   : > { %2097 = vmatpush3.bf16.msra.mxu0 %v799_v10  ;;  %2098 = vmatprep.mubr.msk.bf16.mxu0 %vm729_vm3, %v635_v0  ;;  %v1247_v10 = vsel %vm1103_vm5, %v1045_v9, 0 }
 0x1bc   : > { %2102 = vmatprep.subr.bf16.mxu0 %v727_v16 }
 0x1c6   : > { %2099 = vmatmul.mubr.msk.bf16.vlgmr.msra.gmra.mrb[4].mxu0 %vm729_vm3, %v637_v1 }
 0x1c7   : > { %2103 = vmatpush3.bf16.msra.mxu0 %v727_v16  ;;  %2106 = vmatprep.mubr.msk.bf16.mxu0 %vm671_vm0, %v2366_v2 }
 0x1c8   : > { %2104 = vmatprep.subr.bf16.mxu0 %v728_v14 }
 0x1cb   : > { %2105 = vmatpush3.bf16.msra.mxu0 %v728_v14 }
 0x1cc   : > { %2110 = vmatprep.subr.bf16.mxu0 %v920_v18 }
 0x1ce   : > { %2107 = vmatmul.mubr.msk.bf16.vlgmr.msra.gmra.mrb[8].mxu0 %vm671_vm0, %v2367_v3 }
 0x1cf   : > { %2111 = vmatpush3.bf16.msra.mxu0 %v920_v18 }
 0x1d0   : > { %2116 = vmatprep.subr.bf16.mxu0 %v2665_v37 }
 0x2a1   : > { %v2108_v19 = vpop.f32.mrb[8].mxu0 }
 0x2a2   : > { %v901_v20 = vmul.f32 2.0, %v2108_v19  ;;  %v884_v22 = vpop.f32.mrb[9].mxu0 }
 0x2a3   : > { %v899_v24 = vmul.f32 2.0, %v884_v22  ;;  %v2109_v26 = vpop.f32.mrb[10].mxu0 }
 0x2a4   : > { %v902_v28 = vmul.f32 2.0, %v2109_v26  ;;  %v887_v29 = vpop.f32.mrb[11].mxu0  ;;  %v909_v31 = vsub.f32 %v901_v20, %v905_v21 }
 0x2a5   : > { %v900_v30 = vmul.f32 2.0, %v887_v29  ;;  %v907_v33 = vsub.f32 %v899_v24, %v903_v25 }
 0x2a6   : > { %v910_v32 = vsub.f32 %v902_v28, %v906_v23  ;;  %v2008_v28 = vld [vmem:[#allocation11] ss:$0 sm:$0xff] }
 0x2a7   : > { %v908_v34 = vsub.f32 %v900_v30, %v904_v27 }
 0x2a8   : > { %v912_v35 = vpack.c.bf16 %v910_v32, %v909_v31 }
 0x2a9   : > { %v911_v36 = vpack.c.bf16 %v908_v34, %v907_v33 }
 0x2ab   : > { %2112 = vmatprep.mubr.msk.bf16.mxu0 %vm729_vm3, %v911_v36 }
 0x2ac   : > { %2113 = vmatmul.mubr.msk.bf16.vlgmr.msra.gmra.mrb[4].mxu0 %vm729_vm3, %v912_v35 }
 0x2ad   : > { %2120 = vmatprep.mubr.msk.bf16.mxu0 %vm2666_vm4, %v2665_v37 }
 0x37f   : > { %v2114_v39 = vpop.f32.mrb[4].mxu0 }
 0x380   : > { %v983_v40 = vadd.f32 %v2114_v39, %v1999_v38  ;;  %v956_v41 = vpop.f32.mrb[5].mxu0 }
 0x381   : > { %v981_v42 = vadd.f32 %v1999_v38, %v956_v41  ;;  %v2115_v43 = vpop.f32.mrb[6].mxu0  ;;  %v1047_v41 = vld [vmem:[%s3177_s12] sm:$0xf] }
 0x382   : > { %v984_v44 = vadd.f32 %v2115_v43, %v1999_v38  ;;  %v959_v45 = vpop.f32.mrb[7].mxu0  ;;  %v987_v47 = vmax.f32 %v983_v40, 0.0 }
 0x383   : > { %v982_v46 = vadd.f32 %v1999_v38, %v959_v45  ;;  %v985_v49 = vmax.f32 %v981_v42, 0.0  ;;  %v2370_v42 = vld [vmem:[%s3178_s13] sm:$0xff]  }
 0x384   : > { %v988_v48 = vmax.f32 %v984_v44, 0.0  ;;  %v2371_v44 = vld [vmem:[%s3178_s13 + $0x8] sm:$0xff]  }
 0x385   : > { %v986_v50 = vmax.f32 %v982_v46, 0.0 }
 0x386   : > { %v990_v51 = vpack.c.bf16 %v988_v48, %v987_v47 }
 0x387   : > { %v989_v52 = vpack.c.bf16 %v986_v50, %v985_v49  ;;  %v2372_v49 = vld [vmem:[%s3178_s13 + $0x10] sm:$0xff]  }
 0x389   : > { %2117 = vmatpush3.bf16.msra.mxu0 %v989_v52 }
 0x38a   : > { %2118 = vmatprep.subr.bf16.mxu0 %v2665_v37 }
 0x38d   : > { %2119 = vmatpush3.bf16.msra.mxu0 %v990_v51  ;;  %v2373_v51 = vld [vmem:[%s3178_s13 + $0x18] sm:$0xff]  }
 0x38e   : > { %2130 = vmatprep.subr.bf16.mxu0 %v2665_v37 }
 0x390   : > { %2121 = vmatmul.mubr.msk.bf16.vlgmr.msra.gmra.mrb[12].mxu0 %vm671_vm0, %v2368_v53  ;;  %v2374_v53 = vld [vmem:[%s3178_s13 + $0x20] sm:$0xff]  }
 0x391   : > { %2132 = vmatprep.mubr.msk.bf16.mxu0 %vm2666_vm4, %v2665_v37  ;;  %2131 = vmatpush3.bf16.msra.mxu0 %v1105_v63  ;;  %v1363_v63 = vld [vmem:[#allocation13] sm:$0x1] }
 0x392   : > { %2142 = vmatprep.subr.bf16.mxu0 %v2665_v37 }
 0x463   : > { %v1033_v54 = vpop.f32.mrb[12].mxu0 }
 0x464   : > { %v2122_v55 = vpop.f32.mrb[13].mxu0 }
 0x465   : > { %v1036_v56 = vpop.f32.mrb[14].mxu0  ;;  %v2375_v55 = vld [vmem:[%s3178_s13 + $0x28] sm:$0xff]  }
 0x466   : > { %v1040_v57 = vpack.c.bf16 %v1036_v56, %v1033_v54  ;;  %v2123_v58 = vpop.f32.mrb[15].mxu0 }
 0x468   : > { %2125 = vmatpush3.bf16.msra.mxu1 %v1040_v57  ;;  %v1238_v19 = vunpack.c.l.bf16 %v1040_v57  ;;  %v1239_v24 = vunpack.c.h.bf16 %v1040_v57 }
 0x469   : > { %2136 = vmatprep.subr.bf16.mxu1 %v2665_v37 }
 0x46b   : > { %2127 = vmatmul.mubr.msk.bf16.vlgmr.msra.gmra.mrb[0].mxu1 %vm1053_vm6, %v2369_v60 }
 0x46c   : > { %2137 = vmatpush3.bf16.msra.mxu1 %v1152_v61  ;;  %2138 = vmatprep.mubr.msk.bf16.mxu1 %vm2666_vm4, %v2665_v37 }
 0x46d   : > { %2148 = vmatprep.subr.bf16.mxu1 %v2665_v37 }
 0x473   : > { %2139 = vmatmul.mubr.msk.bf16.vlgmr.msra.gmra.mrb[4].mxu1 %vm1099_vm7, %v1040_v57  ;;  %v2376_v57 = vld [vmem:[%s3178_s13 + $0x30] sm:$0xff]  }
 0x474   : > { %2150 = vmatprep.mubr.msk.bf16.mxu1 %vm2666_vm4, %v2665_v37  ;;  %2149 = vmatpush3.bf16.msra.mxu1 %v1247_v10 }
 0x475   : > { %2160 = vmatprep.subr.bf16.mxu1 %v2665_v37 }
 0x53e   : > { %v1091_v0 = vpop.f32.mrb[0].mxu1 }
 0x53f   : > { %v2128_v1 = vpop.f32.mrb[1].mxu1 }
 0x540   : > { %v1094_v2 = vpop.f32.mrb[2].mxu1 }
 0x541   : > { %v1098_v3 = vpack.c.bf16 %v1094_v2, %v1091_v0  ;;  %v2129_v4 = vpop.f32.mrb[3].mxu1 }
 0x543   : > { %2133 = vmatmul.mubr.msk.bf16.vlgmr.msra.gmra.mrb[16].mxu0 %vm1099_vm7, %v1098_v3 }
 0x544   : > { %2143 = vmatpush3.bf16.msra.mxu0 %v1098_v3  ;;  %2144 = vmatprep.mubr.msk.bf16.mxu0 %vm2666_vm4, %v2665_v37 }
 0x545   : > { %2154 = vmatprep.subr.bf16.mxu0 %v2665_v37 }
 0x546   : > { %v1188_v5 = vpop.f32.mrb[4].mxu1 }
 0x547   : > { %v2140_v6 = vpop.f32.mrb[5].mxu1 }
 0x548   : > { %v1191_v7 = vpop.f32.mrb[6].mxu1 }
 0x549   : > { %v2141_v8 = vpop.f32.mrb[7].mxu1 }
 0x54b   : > { %2145 = vmatmul.mubr.msk.bf16.vlgmr.msra.gmra.mrb[20].mxu0 %vm1053_vm6, %v2369_v60 }
 0x54c   : > { %2156 = vmatprep.mubr.msk.bf16.mxu0 %vm2666_vm4, %v2665_v37 }
 0x616   : > { %v1141_v11 = vpop.f32.mrb[16].mxu0 }
 0x617   : > { %v1189_v12 = vadd.f32 %v1188_v5, %v1141_v11  ;;  %v2134_v13 = vpop.f32.mrb[17].mxu0 }
 0x618   : > { %v1144_v14 = vpop.f32.mrb[18].mxu0 }
 0x619   : > { %v1192_v15 = vadd.f32 %v1191_v7, %v1144_v14  ;;  %v2135_v16 = vpop.f32.mrb[19].mxu0 }
 0x61e   : > { %v1229_v17 = vpop.f32.mrb[20].mxu0 }
 0x61f   : > { %v1236_v18 = vmul.f32 2.0, %v1229_v17  ;;  %v2146_v20 = vpop.f32.mrb[21].mxu0 }
 0x620   : > { %v1232_v21 = vpop.f32.mrb[22].mxu0 }
 0x621   : > { %v1240_v22 = vsub.f32 %v1236_v18, %v1238_v19  ;;  %v1237_v23 = vmul.f32 2.0, %v1232_v21  ;;  %v2147_v25 = vpop.f32.mrb[23].mxu0 }
 0x623   : > { %v1241_v26 = vsub.f32 %v1237_v23, %v1239_v24 }
 0x625   : > { %v1242_v27 = vpack.c.bf16 %v1241_v26, %v1240_v22 }
 0x627   : > { %2151 = vmatmul.mubr.msk.bf16.vlgmr.msra.gmra.mrb[8].mxu1 %vm1099_vm7, %v1242_v27 }
 0x628   : > { %2162 = vmatprep.mubr.msk.bf16.mxu1 %vm2666_vm4, %v2665_v37  ;;  %2161 = vmatpush3.bf16.msra.mxu1 %v2370_v42 }
 0x629   : > { %2166 = vmatprep.subr.bf16.mxu1 %v2665_v37 }
 0x6fa   : > { %v1283_v29 = vpop.f32.mrb[8].mxu1 }
 0x6fb   : > { %v1290_v30 = vadd.f32 %v1283_v29, %v1189_v12  ;;  %v2152_v31 = vpop.f32.mrb[9].mxu1 }
 0x6fc   : > { %v1286_v32 = vpop.f32.mrb[10].mxu1 }
 0x6fd   : > { %v1298_v33 = vadd.f32 %v2008_v28, %v1290_v30  ;;  %v1291_v34 = vadd.f32 %v1286_v32, %v1192_v15  ;;  %v2153_v35 = vpop.f32.mrb[11].mxu1 }
 0x6ff   : > { %v1299_v36 = vadd.f32 %v2008_v28, %v1291_v34  ;;  %v1300_v38 = vmax.f32 %v1298_v33, 0.0 }
 0x701   : > { %v1301_v39 = vmax.f32 %v1299_v36, 0.0 }
 0x703   : > { %v1302_v40 = vpack.c.bf16 %v1301_v39, %v1300_v38 }
 0x705   : > { %2155 = vmatpush3.bf16.msra.mxu0 %v1302_v40 }
 0x706   : > { %2208 = vmatprep.subr.bf16.mxu0 %v2665_v37 }
 0x708   : > { %2157 = vmatmul.mubr.msk.bf16.vlgmr.msra.gmra.mrb[24].mxu0 %vm1053_vm6, %v1047_v41 }
 0x709   : > { %2210 = vmatprep.mubr.msk.bf16.mxu0 %vm2666_vm4, %v2665_v37  ;;  %2209 = vmatpush3.bf16.msra.mxu0 %v2378_v62 }
 0x7db   : > { %v1340_v43 = vpop.f32.mrb[24].mxu0 }
 0x7dc   : > { %v1346_v45 = vpack.c.bf16 %v1340_v43, %v1340_v43  ;;  %v2158_v46 = vpop.f32.mrb[25].mxu0 }
 0x7dd   : > { %v1343_v47 = vpop.f32.mrb[26].mxu0 }
 0x7de   : > { %2163 = vmatmul.mubr.msk.bf16.vlgmr.msra.gmra.mrb[12].mxu1 %vm1053_vm6, %v1346_v45  ;;  %v2159_v48 = vpop.f32.mrb[27].mxu0  ;;  %v1417_v50 = vshrl.u32 %v1346_v45, 16  ;;  %v1470_v52 = vrot.slane %v1346_v45, 1  ;;  %v1572_v56 = vrot.slane %v1346_v45, 2  ;;  %v1674_v60 = vrot.slane %v1346_v45, 3 }
 0x7df   : > { %2167 = vmatpush3.bf16.msra.mxu1 %v2371_v44  ;;  %2168 = vmatprep.mubr.msk.bf16.mxu1 %vm2666_vm4, %v2665_v37 }
 0x7e0   : > { %2172 = vmatprep.subr.bf16.mxu1 %v2665_v37  ;;  %v1521_v54 = vrot.slane %v1417_v50, 1  ;;  %v1623_v58 = vrot.slane %v1417_v50, 2  ;;  %v1725_v61 = vrot.slane %v1417_v50, 3 }
 0x7ea   : > { %2169 = vmatmul.mubr.msk.bf16.vlgmr.msra.gmra.mrb[12].mxu1 %vm1053_vm6, %v1417_v50 }
 0x7eb   : > { %2173 = vmatpush3.bf16.msra.mxu1 %v2372_v49  ;;  %2174 = vmatprep.mubr.msk.bf16.mxu1 %vm2666_vm4, %v2665_v37 }
 0x7ec   : > { %2178 = vmatprep.subr.bf16.mxu1 %v2665_v37 }
 0x7f6   : > { %2175 = vmatmul.mubr.msk.bf16.vlgmr.msra.gmra.mrb[12].mxu1 %vm1053_vm6, %v1470_v52 }
 0x7f7   : > { %2179 = vmatpush3.bf16.msra.mxu1 %v2373_v51  ;;  %2180 = vmatprep.mubr.msk.bf16.mxu1 %vm2666_vm4, %v2665_v37 }
 0x7f8   : > { %2184 = vmatprep.subr.bf16.mxu1 %v2665_v37 }
 0x802   : > { %2181 = vmatmul.mubr.msk.bf16.vlgmr.msra.gmra.mrb[12].mxu1 %vm1053_vm6, %v1521_v54 }
 0x803   : > { %2185 = vmatpush3.bf16.msra.mxu1 %v2374_v53  ;;  %2186 = vmatprep.mubr.msk.bf16.mxu1 %vm2666_vm4, %v2665_v37 }
 0x804   : > { %2190 = vmatprep.subr.bf16.mxu1 %v2665_v37 }
 0x80e   : > { %2187 = vmatmul.mubr.msk.bf16.vlgmr.msra.gmra.mrb[12].mxu1 %vm1053_vm6, %v1572_v56 }
 0x80f   : > { %2191 = vmatpush3.bf16.msra.mxu1 %v2375_v55  ;;  %2192 = vmatprep.mubr.msk.bf16.mxu1 %vm2666_vm4, %v2665_v37 }
 0x810   : > { %2196 = vmatprep.subr.bf16.mxu1 %v2665_v37 }
 0x81a   : > { %2193 = vmatmul.mubr.msk.bf16.vlgmr.msra.gmra.mrb[12].mxu1 %vm1053_vm6, %v1623_v58 }
 0x81b   : > { %2197 = vmatpush3.bf16.msra.mxu1 %v2376_v57  ;;  %2198 = vmatprep.mubr.msk.bf16.mxu1 %vm2666_vm4, %v2665_v37 }
 0x81c   : > { %2202 = vmatprep.subr.bf16.mxu1 %v2665_v37 }
 0x826   : > { %2199 = vmatmul.mubr.msk.bf16.vlgmr.msra.gmra.mrb[12].mxu1 %vm1053_vm6, %v1674_v60 }
 0x827   : > { %2203 = vmatpush3.bf16.msra.mxu1 %v2377_v59  ;;  %2204 = vmatprep.mubr.msk.bf16.mxu1 %vm2666_vm4, %v2665_v37  ;;  %v1366_v37 = vld [vmem:[%s3225_s26] sm:$0x1] }
 0x832   : > { %2205 = vmatmul.mubr.msk.bf16.vlgmr.msra.gmra.mrb[12].mxu1 %vm1053_vm6, %v1725_v61 }
 0x905   : > { %v1769_v0 = vpop.f32.mrb[12].mxu1 }
 0x906   : > { %v2214_v1 = vadd.f32 %v1769_v0, %v1363_v63  ;;  %v2206_v2 = vpop.f32.mrb[13].mxu1 }
 0x907   : > { %v1772_v3 = vpop.f32.mrb[14].mxu1 }
 0x908   : > { %v1776_v4 = vmax.f32 %v2214_v1, 0.0  ;;  %v2207_v5 = vpop.f32.mrb[15].mxu1 }
 0x90a   : > { %v1777_v6 = vpack.c.bf16 %v1776_v4, %v1776_v4 }
 0x90c   : > { %2211 = vmatmul.mubr.msk.bf16.vlgmr.msra.gmra.mrb[28].mxu0 %vm1053_vm6, %v1777_v6 }
 0x9df   : > { %v1821_v7 = vpop.f32.mrb[28].mxu0 }
 0x9e0   : > { %v1822_v8 = vadd.f32 %v1821_v7, %v1366_v37  ;;  %v2212_v9 = vpop.f32.mrb[29].mxu0 }
 0x9e1   : > { %v1824_v10 = vpop.f32.mrb[30].mxu0 }
 0x9e2   : > { %1827 = vst [vmem:[%s628_s1] sm:$0x1] %v1822_v8  ;;  %v2213_v11 = vpop.f32.mrb[31].mxu0 }
 0x9e3   : > { %2590 = shalt.err (!%p2587_p6)
}
 0x9e4   : > { %s2591_s23 = scalar_lea.hbm %s3123_s24, 16  ;;  %s2595_s20 = scalar_lea.hbm %s3227_s22, 32 }
 0x9e5   : > { %p2592_p5 = scmp.ne.s32.totalorder %s3123_s24, %s2591_s23  ;;  %p2596_p10 = scmp.lt.u32.totalorder %s3123_s24, %s3227_s22 }
 0x9e6   : > { %p2597_p2 = scmp.lt.u32.totalorder %s2595_s20, %s2591_s23  ;;  %p2599_p4 = scmp.lt.u32.totalorder %s2591_s23, %s3123_s24 }
 0x9e7   : > { %p2593_p9 = pnand %p2592_p5, %p3228_p7 }
 0x9e8   : > { %p2598_p3 = por %p2597_p2, %p2596_p10 }
 0x9e9   : > { %p2594_p12 = pneg %p2593_p9 }
 0x9ea   : > { %p2600_p8 = por %p2599_p4, %p2598_p3 }
 0x9ec   : > { %p2601_p11 = pnand %p2600_p8, %p2594_p12 }
 0x9ee   : > { %2604 = shalt.err (!%p2601_p11)
}
 0x9ef   : > { %2279 = dma.vmem_to_hbm [thread:$0]  (%p3228_p7), %s3125_s21, 16, %s3123_s24, %s1829_s17  }
 0x9f0 PF: > { %s3229_s29 = sld [smem:[#allocation22_spill]]  ;;  %s3230_s28 = sld [smem:[#allocation20_spill]] }
 0x9f1   : > { %s3231_s19 = sld [smem:[#allocation26_spill]] }
 0x9f6   : > { %p2321_p13 = scmp.ge.s32.totalorder %s3229_s29, 2  ;;  %s1853_s0 = sand.u32 1, %s3230_s28  }
 0x9f7   : > { %p3232_p1 = scmp.ne.s32.totalorder %s3231_s19, 0  ;;  %s1854_s16 = scalar_lea.sflag [#allocation4], %s1853_s0 }
 0x9f9   : > { %p2304_p0 = pnand %p2321_p13, %p3232_p1 }
 0x9fb   : > { %2638 = dma.done.wait (!%p2304_p0), %s1854_s16, 16  }
 0x9fc   : > { %2640 = vsyncadd (!%p2304_p0), %s1854_s16, 4294967280  ;;  %s3233_s27 = sld [smem:[#allocation23_spill]]  ;;  %s3234_s23 = sld [smem:[#allocation21_spill]] }
 0x9fd   : > { %s3235_s26 = sld [smem:[#allocation24_spill]]  ;;  %s3236_s24 = smov %s2647_s25 }
 0xa02   : > { %p31_p6 = scmp.ge.s32.totalorder %s3233_s27, 4   ;;  %s3237_s25 = smov %s3234_s23 }
 0xa04   :  { %33 = sbr.rel (!%p31_p6) target bundleno = 13 (0xd), region = 152 }
 0xa0b   :  { %1858 = vsyncpa [#allocation3], 1 }
 0xa0c   :  { %1860 = vsyncpa [#allocation3 + $0x1], 1 }
 0xa0d   :  { %1861 = vsyncpa [#allocation6], 1 }
 0xa0e   :  { %1862 = vsyncpa [#allocation9], 1 }
 0xa0f   :  { %1863 = vsyncpa [#allocation12], 1 }
 0xa10   :  { %1864 = vsyncpa [#allocation4], 1 }
 0xa11   :  { %1866 = vsyncpa [#allocation4 + $0x1], 1 }

</bundles_post_ra>
